<compile_context>
chip_gen: v5e
topology: v5e:2x2
jax: 0.10.0
libtpu: 0.0.40
codegen_flags: <defaults>
</compile_context>

<pallas_src>
import jax
import jax.numpy as jnp
from jax.experimental import pallas as pl
from jax.experimental.pallas import tpu as pltpu


def _round_up(x, m):
    return ((x + m - 1) // m) * m


def overparam_kernel(x_ref, wc_ref, wf_ref, bc_ref, bf_ref, o_ref,
                     acc_c_ref, acc_f_ref):
    # x_ref:  (tm, tk)      wc_ref/wf_ref: (tk, tn)   bc_ref/bf_ref: (1, tn)
    # o_ref:  (tm, tn)      acc_*_ref:     (tm, tn) f32 scratch (resident over K)
    k = pl.program_id(2)

    @pl.when(k == 0)
    def _init():
        acc_c_ref[...] = jnp.zeros_like(acc_c_ref)
        acc_f_ref[...] = jnp.zeros_like(acc_f_ref)

    x = x_ref[...]
    acc_c_ref[...] += jnp.dot(x, wc_ref[...], preferred_element_type=jnp.float32)
    acc_f_ref[...] += jnp.dot(x, wf_ref[...], preferred_element_type=jnp.float32)

    @pl.when(k == pl.num_programs(2) - 1)
    def _finalize():
        c = acc_c_ref[...] + bc_ref[...].astype(jnp.float32)
        f = acc_f_ref[...] + bf_ref[...].astype(jnp.float32)
        # sigmoid(f) == 0.5 * (tanh(f / 2) + 1): single EUP transcendental.
        gate = 0.5 * (jnp.tanh(0.5 * f) + 1.0)
        o_ref[...] = (gate * jnp.tanh(c)).astype(o_ref.dtype)


def overparam_forward(x, w_t, b, *, tm=256, tn_max=512, tk_max=512):
    """x: (..., H); w_t: (H, 2H) (pre-transposed nn.Linear weight); b: (2H,).

    Returns sigmoid(f) * tanh(c) with (c, f) = split(x @ w_t + b, H, axis=-1).
    """
    orig_shape = x.shape
    H = orig_shape[-1]
    x2d = x.reshape(-1, H)
    M = x2d.shape[0]

    # Split the fused Linear into its c / f halves.
    wc, wf = w_t[:, :H], w_t[:, H:]
    bc, bf = b[:H].reshape(1, H), b[H:].reshape(1, H)

    # Lane-dense feature padding (multiple of 128) and row padding to the tile.
    Hp = _round_up(H, 128)
    tm_eff = max(8, min(tm, _round_up(M, 8)))
    Mp = _round_up(M, tm_eff)

    if Hp != H:
        padH = Hp - H
        x2d = jnp.pad(x2d, ((0, 0), (0, padH)))
        wc = jnp.pad(wc, ((0, padH), (0, padH)))
        wf = jnp.pad(wf, ((0, padH), (0, padH)))
        bc = jnp.pad(bc, ((0, 0), (0, padH)))
        bf = jnp.pad(bf, ((0, 0), (0, padH)))
    if Mp != M:
        x2d = jnp.pad(x2d, ((0, Mp - M), (0, 0)))

    def _col_tile(limit):
        t = min(limit, Hp)
        t = max(128, (t // 128) * 128)
        while Hp % t != 0:
            t -= 128
        return t

    tn = _col_tile(tn_max)   # output / weight-column tile
    tk = _col_tile(tk_max)   # reduction (H) tile

    grid = (Mp // tm_eff, Hp // tn, Hp // tk)   # reduction axis last

    out = pl.pallas_call(
        overparam_kernel,
        out_shape=jax.ShapeDtypeStruct((Mp, Hp), x.dtype),
        grid_spec=pltpu.PrefetchScalarGridSpec(
            num_scalar_prefetch=0,
            grid=grid,
            in_specs=[
                pl.BlockSpec((tm_eff, tk), lambda i, j, k: (i, k)),   # x tile
                pl.BlockSpec((tk, tn), lambda i, j, k: (k, j)),       # W_c tile
                pl.BlockSpec((tk, tn), lambda i, j, k: (k, j)),       # W_f tile
                pl.BlockSpec((1, tn), lambda i, j, k: (0, j)),        # b_c tile
                pl.BlockSpec((1, tn), lambda i, j, k: (0, j)),        # b_f tile
            ],
            out_specs=pl.BlockSpec((tm_eff, tn), lambda i, j, k: (i, j)),
            scratch_shapes=[
                pltpu.VMEM((tm_eff, tn), jnp.float32),   # acc_c
                pltpu.VMEM((tm_eff, tn), jnp.float32),   # acc_f
            ],
        ),
        compiler_params=pltpu.CompilerParams(
            dimension_semantics=("parallel", "parallel", "arbitrary"),
            vmem_limit_bytes=64 * 1024 * 1024,
        ),
    )(x2d, wc, wf, bc, bf)

    return out[:M, :H].reshape(orig_shape)


def reference_forward(x, w_t, b):
    H = x.shape[-1]
    y = jnp.einsum("...h,hk->...k", x, w_t) + b
    c, f = y[..., :H], y[..., H:]
    return jax.nn.sigmoid(f) * jnp.tanh(c)


if __name__ == "__main__":
    key = jax.random.PRNGKey(0)
    batch, seq, hidden = 2, 8, 32

    k_x, k_w, k_b = jax.random.split(key, 3)
    x = jax.random.normal(k_x, (batch, seq, hidden), dtype=jnp.float32)

    # Deterministic parameter init mirroring nn.Linear's U(-1/sqrt(H), 1/sqrt(H)).
    bound = 1.0 / (hidden ** 0.5)
    # PyTorch stores weight as (2H, H); we keep the transposed (H, 2H) layout.
    w_t = jax.random.uniform(k_w, (hidden, 2 * hidden),
                             minval=-bound, maxval=bound, dtype=jnp.float32)
    b = jax.random.uniform(k_b, (2 * hidden,),
                           minval=-bound, maxval=bound, dtype=jnp.float32)

    out = overparam_forward(x, w_t, b)
    out = jax.block_until_ready(out)

    ref = reference_forward(x, w_t, b)
    assert out.shape == (batch, seq, hidden)
    assert jnp.allclose(out, ref, atol=1e-5, rtol=1e-5)

    print("KERNEL_OK")
</pallas_src>

<mosaic_0001>
module attributes {stable_mosaic.version = 11 : i64} {
  func.func @overparam_kernel(%arg0: i32, %arg1: i32, %arg2: i32, %arg3: memref<16x128xf32, #tpu.memory_space<vmem>>, %arg4: memref<128x128xf32, #tpu.memory_space<vmem>>, %arg5: memref<128x128xf32, #tpu.memory_space<vmem>>, %arg6: memref<1x128xf32, #tpu.memory_space<vmem>>, %arg7: memref<1x128xf32, #tpu.memory_space<vmem>>, %arg8: memref<16x128xf32, #tpu.memory_space<vmem>>, %arg9: memref<16x128xf32, #tpu.memory_space<vmem>>, %arg10: memref<16x128xf32, #tpu.memory_space<vmem>>) attributes {dimension_semantics = [#tpu.dimension_semantics<parallel>, #tpu.dimension_semantics<parallel>, #tpu.dimension_semantics<arbitrary>], iteration_bounds = array<i64: 1, 1, 1>, scalar_prefetch = 0 : i64, scratch_operands = 2 : i64, tpu.core_type = #tpu.core_type<tc>, window_params = [{transform_indices = @transform_0, window_bounds = array<i64: 16, 128>}, {transform_indices = @transform_1, window_bounds = array<i64: 128, 128>}, {transform_indices = @transform_2, window_bounds = array<i64: 128, 128>}, {transform_indices = @transform_3, window_bounds = array<i64: 1, 128>}, {transform_indices = @transform_4, window_bounds = array<i64: 1, 128>}, {transform_indices = @transform_5, window_bounds = array<i64: 16, 128>}]} {
    %c0_i32 = arith.constant 0 : i32
    %0 = arith.cmpi eq, %arg2, %c0_i32 : i32
    %1 = arith.extui %0 : i1 to i32
    %c0_i32_0 = arith.constant 0 : i32
    %2 = arith.cmpi ne, %1, %c0_i32_0 : i32
    scf.if %2 {
      %cst_17 = arith.constant 0.000000e+00 : f32
      %17 = vector.broadcast %cst_17 : f32 to vector<16x128xf32>
      %c0_18 = arith.constant 0 : index
      %c0_19 = arith.constant 0 : index
      %18 = vector.load %arg9[%c0_18, %c0_19] : memref<16x128xf32, #tpu.memory_space<vmem>>, vector<16x128xf32>
      tpu.vector_store %arg9[%c0_18, %c0_19], %17 {strides = array<i32>} : memref<16x128xf32, #tpu.memory_space<vmem>>, vector<16x128xf32>,
      %cst_20 = arith.constant 0.000000e+00 : f32
      %19 = vector.broadcast %cst_20 : f32 to vector<16x128xf32>
      %c0_21 = arith.constant 0 : index
      %c0_22 = arith.constant 0 : index
      %20 = vector.load %arg10[%c0_21, %c0_22] : memref<16x128xf32, #tpu.memory_space<vmem>>, vector<16x128xf32>
      tpu.vector_store %arg10[%c0_21, %c0_22], %19 {strides = array<i32>} : memref<16x128xf32, #tpu.memory_space<vmem>>, vector<16x128xf32>,
    } else {
    }
    %c0 = arith.constant 0 : index
    %c0_1 = arith.constant 0 : index
    %3 = vector.load %arg3[%c0, %c0_1] : memref<16x128xf32, #tpu.memory_space<vmem>>, vector<16x128xf32>
    %c0_2 = arith.constant 0 : index
    %c0_3 = arith.constant 0 : index
    %4 = vector.load %arg9[%c0_2, %c0_3] : memref<16x128xf32, #tpu.memory_space<vmem>>, vector<16x128xf32>
    %c0_4 = arith.constant 0 : index
    %c0_5 = arith.constant 0 : index
    %5 = vector.load %arg4[%c0_4, %c0_5] : memref<128x128xf32, #tpu.memory_space<vmem>>, vector<128x128xf32>
    %cst = arith.constant dense<0.000000e+00> : vector<16x128xf32>
    %6 = tpu.matmul %3, %5, %cst {dimension_numbers = #tpu.dot_dimension_numbers<[1], [0], [0], [1], [0, 0, 1, 1], [], []>} : vector<16x128xf32>, vector<128x128xf32>, vector<16x128xf32> -> vector<16x128xf32>
    %7 = arith.addf %4, %6 : vector<16x128xf32>
    %c0_6 = arith.constant 0 : index
    %c0_7 = arith.constant 0 : index
    %8 = vector.load %arg9[%c0_6, %c0_7] : memref<16x128xf32, #tpu.memory_space<vmem>>, vector<16x128xf32>
    tpu.vector_store %arg9[%c0_6, %c0_7], %7 {strides = array<i32>} : memref<16x128xf32, #tpu.memory_space<vmem>>, vector<16x128xf32>,
    %c0_8 = arith.constant 0 : index
    %c0_9 = arith.constant 0 : index
    %9 = vector.load %arg10[%c0_8, %c0_9] : memref<16x128xf32, #tpu.memory_space<vmem>>, vector<16x128xf32>
    %c0_10 = arith.constant 0 : index
    %c0_11 = arith.constant 0 : index
    %10 = vector.load %arg5[%c0_10, %c0_11] : memref<128x128xf32, #tpu.memory_space<vmem>>, vector<128x128xf32>
    %cst_12 = arith.constant dense<0.000000e+00> : vector<16x128xf32>
    %11 = tpu.matmul %3, %10, %cst_12 {dimension_numbers = #tpu.dot_dimension_numbers<[1], [0], [0], [1], [0, 0, 1, 1], [], []>} : vector<16x128xf32>, vector<128x128xf32>, vector<16x128xf32> -> vector<16x128xf32>
    %12 = arith.addf %9, %11 : vector<16x128xf32>
    %c0_13 = arith.constant 0 : index
    %c0_14 = arith.constant 0 : index
    %13 = vector.load %arg10[%c0_13, %c0_14] : memref<16x128xf32, #tpu.memory_space<vmem>>, vector<16x128xf32>
    tpu.vector_store %arg10[%c0_13, %c0_14], %12 {strides = array<i32>} : memref<16x128xf32, #tpu.memory_space<vmem>>, vector<16x128xf32>,
    %c0_i32_15 = arith.constant 0 : i32
    %14 = arith.cmpi eq, %arg2, %c0_i32_15 : i32
    %15 = arith.extui %14 : i1 to i32
    %c0_i32_16 = arith.constant 0 : i32
    %16 = arith.cmpi ne, %15, %c0_i32_16 : i32
    scf.if %16 {
      %c0_17 = arith.constant 0 : index
      %c0_18 = arith.constant 0 : index
      %17 = vector.load %arg9[%c0_17, %c0_18] : memref<16x128xf32, #tpu.memory_space<vmem>>, vector<16x128xf32>
      %c0_19 = arith.constant 0 : index
      %c0_20 = arith.constant 0 : index
      %18 = vector.load %arg6[%c0_19, %c0_20] : memref<1x128xf32, #tpu.memory_space<vmem>>, vector<1x128xf32>
      %19 = vector.broadcast %18 : vector<1x128xf32> to vector<16x128xf32>
      %20 = arith.addf %17, %19 : vector<16x128xf32>
      %c0_21 = arith.constant 0 : index
      %c0_22 = arith.constant 0 : index
      %21 = vector.load %arg10[%c0_21, %c0_22] : memref<16x128xf32, #tpu.memory_space<vmem>>, vector<16x128xf32>
      %c0_23 = arith.constant 0 : index
      %c0_24 = arith.constant 0 : index
      %22 = vector.load %arg7[%c0_23, %c0_24] : memref<1x128xf32, #tpu.memory_space<vmem>>, vector<1x128xf32>
      %23 = vector.broadcast %22 : vector<1x128xf32> to vector<16x128xf32>
      %24 = arith.addf %21, %23 : vector<16x128xf32>
      %cst_25 = arith.constant 5.000000e-01 : f32
      %25 = vector.broadcast %cst_25 : f32 to vector<16x128xf32>
      %26 = arith.mulf %25, %24 : vector<16x128xf32>
      %27 = math.tanh %26 : vector<16x128xf32>
      %cst_26 = arith.constant 1.000000e+00 : f32
      %28 = vector.broadcast %cst_26 : f32 to vector<16x128xf32>
      %29 = arith.addf %27, %28 : vector<16x128xf32>
      %cst_27 = arith.constant 5.000000e-01 : f32
      %30 = vector.broadcast %cst_27 : f32 to vector<16x128xf32>
      %31 = arith.mulf %30, %29 : vector<16x128xf32>
      %32 = math.tanh %20 : vector<16x128xf32>
      %33 = arith.mulf %31, %32 : vector<16x128xf32>
      %c0_28 = arith.constant 0 : index
      %c0_29 = arith.constant 0 : index
      %34 = vector.load %arg8[%c0_28, %c0_29] : memref<16x128xf32, #tpu.memory_space<vmem>>, vector<16x128xf32>
      tpu.vector_store %arg8[%c0_28, %c0_29], %33 {strides = array<i32>} : memref<16x128xf32, #tpu.memory_space<vmem>>, vector<16x128xf32>,
    } else {
    }
    return
  }
  func.func @transform_0(%arg0: i32, %arg1: i32, %arg2: i32) -> (i32, i32) {
    %c0_i32 = arith.constant 0 : i32
    return %arg0, %arg2 : i32, i32
  }
  func.func @transform_1(%arg0: i32, %arg1: i32, %arg2: i32) -> (i32, i32) {
    %c0_i32 = arith.constant 0 : i32
    return %arg2, %arg1 : i32, i32
  }
  func.func @transform_2(%arg0: i32, %arg1: i32, %arg2: i32) -> (i32, i32) {
    %c0_i32 = arith.constant 0 : i32
    return %arg2, %arg1 : i32, i32
  }
  func.func @transform_3(%arg0: i32, %arg1: i32, %arg2: i32) -> (i32, i32) {
    %c0_i32 = arith.constant 0 : i32
    %c0_i32_0 = arith.constant 0 : i32
    return %c0_i32, %arg1 : i32, i32
  }
  func.func @transform_4(%arg0: i32, %arg1: i32, %arg2: i32) -> (i32, i32) {
    %c0_i32 = arith.constant 0 : i32
    %c0_i32_0 = arith.constant 0 : i32
    return %c0_i32, %arg1 : i32, i32
  }
  func.func @transform_5(%arg0: i32, %arg1: i32, %arg2: i32) -> (i32, i32) {
    %c0_i32 = arith.constant 0 : i32
    return %arg0, %arg1 : i32, i32
  }
}

</mosaic_0001>

<bundles_post_ra>
// kernel: tpu_custom_call.1
= control target key start
LH: loop header
LB: loop body
LE: loop exit
PB: predicated region body
PF: predicated region fallthrough
CT: control target
= control target key end

     0   :  { %10 = vsyncpa [#allocation5], 0  ;;  %s437_s0 = inlined_call_operand.hbm [shape: f32[16,128], index: 0, kind: input, shape index: {}]   ;;  %s438_s1 = inlined_call_operand.hbm [shape: f32[128,128], index: 1, kind: input, shape index: {}]   ;;  %s439_s2 = inlined_call_operand.hbm [shape: f32[128,128], index: 2, kind: input, shape index: {}]   ;;  %s440_s3 = inlined_call_operand.vmem [shape: f32[1,128], index: 3, kind: input, shape index: {}]   ;;  %s441_s4 = inlined_call_operand.vmem [shape: f32[1,128], index: 4, kind: input, shape index: {}]   ;;  %s442_s5 = inlined_call_operand.hbm [shape: f32[16,128], index: 5, kind: output, shape index: {}]  }
   0x1   :  { %11 = vsyncpa [#allocation8], 0 }
   0x2   :  { %12 = vsyncpa [#allocation6], 0  ;;  %s30_s20 = sshll.u32 %s438_s1, 4  ;;  %s371_s21 = smov [#allocation7]   ;;  %s31_s20 = int_to_ptr.hbm [resolvable:$true] %s30_s20 }
   0x3   :  { %s32_s22 = sshll.u32 %s371_s21, 4  ;;  %s17_s25 = sshll.u32 %s437_s0, 4  ;;  %s33_s22 = int_to_ptr.vmem [resolvable:$true] %s32_s22  ;;  %s18_s25 = int_to_ptr.hbm [resolvable:$true] %s17_s25 }
   0x4   :  { %s372_s26 = smov 128   ;;  %s373_s27 = smov 8  }
   0x5   :  { %38 = dma.hbm_to_vmem [thread:$0]  %s31_s20, 2048, %s33_s22, [#allocation8], %s372_s26, %s372_s26, %s373_s27  }
   0x6   :  { %s374_s28 = smov [#allocation4]   ;;  %s43_s1 = sshll.u32 %s439_s2, 4  ;;  %s44_s1 = int_to_ptr.hbm [resolvable:$true] %s43_s1 }
   0x7   :  { %s19_s29 = sshll.u32 %s374_s28, 4  ;;  %s375_s0 = smov [#allocation9]   ;;  %s20_s29 = int_to_ptr.vmem [resolvable:$true] %s19_s29 }
   0x8   :  { %25 = dma.hbm_to_vmem [thread:$0]  %s18_s25, 256, %s20_s29, [#allocation5], %s372_s26, %s372_s26, %s373_s27  }
   0x9   :  { %s45_s7 = sshll.u32 %s375_s0, 4  ;;  %s46_s7 = int_to_ptr.vmem [resolvable:$true] %s45_s7 }
   0xa   :  { %51 = dma.hbm_to_vmem [thread:$0]  %s44_s1, 2048, %s46_s7, [#allocation8], %s372_s26, %s372_s26, %s373_s27  }
   0xb   :  { %365 = dma.done.wait [#allocation5], 256  }
   0xc   :  { %366 = vsyncadd [#allocation5], 4294967040 }
   0xd   :  { %367 = dma.done.wait [#allocation8], 4096  }
   0xe   :  { %368 = vsyncadd [#allocation8], 4294963200  ;;  %v140_v0 = vld [vmem:[#allocation9 + $0x78] sm:$0xff]  ;;  %v139_v1 = vld [vmem:[#allocation9 + $0x70] sm:$0xff]  ;;  %s207_s13 = sshll.u32 %s442_s5, 4  ;;  %s208_s13 = int_to_ptr.hbm [resolvable:$true] %s207_s13 }
   0xf   :  { %237 = vmatpush.msra.mxu3 %v140_v0  ;;  %v95_v2 = vld [vmem:[#allocation7 + $0x78] sm:$0xff]  ;;  %141 = vmatpush.msra.mxu1 %v140_v0  ;;  %v94_v3 = vld [vmem:[#allocation7 + $0x70] sm:$0xff]  ;;  %v138_v4 = vld [vmem:[#allocation9 + $0x68] sm:$0xff] }
  0x10   :  { %221 = vmatpush.msra.mxu2 %v95_v2  ;;  %96 = vmatpush.msra.mxu0 %v95_v2  ;;  %v93_v5 = vld [vmem:[#allocation7 + $0x68] sm:$0xff]  ;;  %v137_v6 = vld [vmem:[#allocation9 + $0x60] sm:$0xff]  ;;  %v136_v8 = vld [vmem:[#allocation9 + $0x58] sm:$0xff] }
  0x11   :  { %238 = vmatpush.msra.mxu3 %v139_v1  ;;  %142 = vmatpush.msra.mxu1 %v139_v1  ;;  %v92_v7 = vld [vmem:[#allocation7 + $0x60] sm:$0xff]  ;;  %v91_v9 = vld [vmem:[#allocation7 + $0x58] sm:$0xff]  ;;  %v135_v10 = vld [vmem:[#allocation9 + $0x50] sm:$0xff] }
  0x12   :  { %222 = vmatpush.msra.mxu2 %v94_v3  ;;  %97 = vmatpush.msra.mxu0 %v94_v3  ;;  %v90_v11 = vld [vmem:[#allocation7 + $0x50] sm:$0xff]  ;;  %v134_v12 = vld [vmem:[#allocation9 + $0x48] sm:$0xff]  ;;  %v133_v14 = vld [vmem:[#allocation9 + $0x40] sm:$0xff] }
  0x13   :  { %239 = vmatpush.msra.mxu3 %v138_v4  ;;  %143 = vmatpush.msra.mxu1 %v138_v4  ;;  %v89_v13 = vld [vmem:[#allocation7 + $0x48] sm:$0xff]  ;;  %v88_v15 = vld [vmem:[#allocation7 + $0x40] sm:$0xff]  ;;  %v132_v16 = vld [vmem:[#allocation9 + $0x38] sm:$0xff] }
  0x14   :  { %223 = vmatpush.msra.mxu2 %v93_v5  ;;  %98 = vmatpush.msra.mxu0 %v93_v5  ;;  %v87_v17 = vld [vmem:[#allocation7 + $0x38] sm:$0xff]  ;;  %v131_v18 = vld [vmem:[#allocation9 + $0x30] sm:$0xff]  ;;  %v130_v20 = vld [vmem:[#allocation9 + $0x28] sm:$0xff] }
  0x15   :  { %240 = vmatpush.msra.mxu3 %v137_v6  ;;  %144 = vmatpush.msra.mxu1 %v137_v6  ;;  %v86_v19 = vld [vmem:[#allocation7 + $0x30] sm:$0xff]  ;;  %v85_v21 = vld [vmem:[#allocation7 + $0x28] sm:$0xff]  ;;  %v129_v22 = vld [vmem:[#allocation9 + $0x20] sm:$0xff] }
  0x16   :  { %224 = vmatpush.msra.mxu2 %v92_v7  ;;  %99 = vmatpush.msra.mxu0 %v92_v7  ;;  %v84_v23 = vld [vmem:[#allocation7 + $0x20] sm:$0xff]  ;;  %v128_v24 = vld [vmem:[#allocation9 + $0x18] sm:$0xff]  ;;  %v127_v26 = vld [vmem:[#allocation9 + $0x10] sm:$0xff] }
  0x17   :  { %241 = vmatpush.msra.mxu3 %v136_v8  ;;  %145 = vmatpush.msra.mxu1 %v136_v8  ;;  %v83_v25 = vld [vmem:[#allocation7 + $0x18] sm:$0xff]  ;;  %v82_v27 = vld [vmem:[#allocation7 + $0x10] sm:$0xff]  ;;  %v126_v28 = vld [vmem:[#allocation9 + $0x8] sm:$0xff] }
  0x18   :  { %225 = vmatpush.msra.mxu2 %v91_v9  ;;  %100 = vmatpush.msra.mxu0 %v91_v9  ;;  %v81_v29 = vld [vmem:[#allocation7 + $0x8] sm:$0xff]  ;;  %v125_v30 = vld [vmem:[#allocation9] sm:$0xff]  ;;  %v77_v31 = vld [vmem:[#allocation4 + $0x8] sm:$0xff] }
  0x19   :  { %242 = vmatpush.msra.mxu3 %v135_v10  ;;  %146 = vmatpush.msra.mxu1 %v135_v10  ;;  %v80_v32 = vld [vmem:[#allocation7] sm:$0xff]  ;;  %v76_v33 = vld [vmem:[#allocation4] sm:$0xff] }
  0x1a   :  { %226 = vmatpush.msra.mxu2 %v90_v11  ;;  %101 = vmatpush.msra.mxu0 %v90_v11  ;;  %v259_v34 = vld [vmem:[%s441_s4] ss:$0 sm:$0xff] }
  0x1b   :  { %243 = vmatpush.msra.mxu3 %v134_v12  ;;  %147 = vmatpush.msra.mxu1 %v134_v12  ;;  %v260_v35 = vld [vmem:[%s440_s3] ss:$0 sm:$0xff]  ;;  %s376_s3 = smov [#allocation10]  }
  0x1c   :  { %227 = vmatpush.msra.mxu2 %v89_v13  ;;  %102 = vmatpush.msra.mxu0 %v89_v13  ;;  %s205_s4 = sshll.u32 %s376_s3, 4  ;;  %s206_s4 = int_to_ptr.vmem [resolvable:$true] %s205_s4 }
  0x1d   :  { %244 = vmatpush.msra.mxu3 %v133_v14  ;;  %148 = vmatpush.msra.mxu1 %v133_v14 }
  0x1e   :  { %228 = vmatpush.msra.mxu2 %v88_v15  ;;  %103 = vmatpush.msra.mxu0 %v88_v15 }
  0x1f   :  { %245 = vmatpush.msra.mxu3 %v132_v16  ;;  %149 = vmatpush.msra.mxu1 %v132_v16 }
  0x20   :  { %229 = vmatpush.msra.mxu2 %v87_v17  ;;  %104 = vmatpush.msra.mxu0 %v87_v17 }
  0x21   :  { %246 = vmatpush.msra.mxu3 %v131_v18  ;;  %150 = vmatpush.msra.mxu1 %v131_v18 }
  0x22   :  { %230 = vmatpush.msra.mxu2 %v86_v19  ;;  %105 = vmatpush.msra.mxu0 %v86_v19 }
  0x23   :  { %247 = vmatpush.msra.mxu3 %v130_v20  ;;  %151 = vmatpush.msra.mxu1 %v130_v20 }
  0x24   :  { %231 = vmatpush.msra.mxu2 %v85_v21  ;;  %106 = vmatpush.msra.mxu0 %v85_v21 }
  0x25   :  { %248 = vmatpush.msra.mxu3 %v129_v22  ;;  %152 = vmatpush.msra.mxu1 %v129_v22 }
  0x26   :  { %232 = vmatpush.msra.mxu2 %v84_v23  ;;  %107 = vmatpush.msra.mxu0 %v84_v23 }
  0x27   :  { %249 = vmatpush.msra.mxu3 %v128_v24  ;;  %153 = vmatpush.msra.mxu1 %v128_v24 }
  0x28   :  { %233 = vmatpush.msra.mxu2 %v83_v25  ;;  %108 = vmatpush.msra.mxu0 %v83_v25 }
  0x29   :  { %250 = vmatpush.msra.mxu3 %v127_v26  ;;  %154 = vmatpush.msra.mxu1 %v127_v26 }
  0x2a   :  { %234 = vmatpush.msra.mxu2 %v82_v27  ;;  %109 = vmatpush.msra.mxu0 %v82_v27 }
  0x2b   :  { %251 = vmatpush.msra.mxu3 %v126_v28  ;;  %155 = vmatpush.msra.mxu1 %v126_v28 }
  0x2c   :  { %235 = vmatpush.msra.mxu2 %v81_v29  ;;  %110 = vmatpush.msra.mxu0 %v81_v29 }
  0x2d   :  { %252 = vmatpush.msra.mxu3 %v125_v30  ;;  %156 = vmatpush.msra.mxu1 %v125_v30 }
  0x2e   :  { %160 = vmatmul.f32.vlgmr.msra.gmra.mxu3 %v77_v31  ;;  %236 = vmatpush.msra.mxu2 %v80_v32 }
  0x2f   :  { %115 = vmatmul.f32.vlgmr.msra.gmra.mxu2 %v77_v31  ;;  %157 = vmatmul.f32.vlgmr.msra.gmra.mxu1 %v76_v33 }
  0x30   :  { %111 = vmatpush.msra.mxu0 %v80_v32 }
  0x31   :  { %112 = vmatmul.f32.vlgmr.msra.gmra.mxu0 %v76_v33 }
  0xac   :  { %v158_v36 = vpop.f32.mrf.mxu1 }
  0xad   :  { %v185_v37 = vadd.f32 %v259_v34, %v158_v36 }
  0xae   :  { %v113_v38 = vpop.f32.mrf.mxu0 }
  0xaf   :  { %v187_v39 = vmul.f32 0.5, %v185_v37  ;;  %v177_v40 = vadd.f32 %v260_v35, %v113_v38 }
  0xb1   :  { %261 = vtanh.f32 %v187_v39  ;;  %v161_v41 = vpop.f32.mrf.mxu3 }
  0xb2   :  { %v186_v42 = vadd.f32 %v259_v34, %v161_v41  ;;  %v116_v43 = vpop.f32.mrf.mxu2  ;;  %263 = vtanh.f32 %v177_v40 }
  0xb3   :  { %v178_v45 = vadd.f32 %v260_v35, %v116_v43 }
  0xb4   :  { %v188_v44 = vmul.f32 0.5, %v186_v42 }
  0xb6   :  { %265 = vtanh.f32 %v188_v44 }
  0xb7   :  { %v262_v46 = vpop.eup %261  ;;  %267 = vtanh.f32 %v178_v45 }
  0xb8   :  { %v191_v47 = vadd.f32 1.0, %v262_v46  ;;  %v264_v48 = vpop.eup %263 }
  0xba   :  { %v193_v49 = vmul.f32 0.5, %v191_v47 }
  0xbc   :  { %v266_v50 = vpop.eup %265  ;;  %v197_v51 = vmul.f32 %v264_v48, %v193_v49 }
  0xbd   :  { %v192_v52 = vadd.f32 1.0, %v266_v50  ;;  %v268_v53 = vpop.eup %267 }
  0xbe   :  { %199 = vst [vmem:[#allocation10] sm:$0xff] %v197_v51 }
  0xbf   :  { %v194_v54 = vmul.f32 0.5, %v192_v52 }
  0xc1   :  { %v198_v55 = vmul.f32 %v268_v53, %v194_v54 }
  0xc3   :  { %200 = vst [vmem:[#allocation10 + $0x8] sm:$0xff] %v198_v55 }
  0xc4   :  { %213 = dma.vmem_to_hbm [thread:$0]  %s206_s4, 256, %s208_s13, [#allocation6], %s372_s26, %s372_s26, %s373_s27  }
  0xc5   :  { %369 = dma.done.wait [#allocation6], 256  }
  0xc6   :  { %370 = vsyncadd [#allocation6], 4294967040 }
  0xc7   :  { %218 = vsyncpa [#allocation5], 1 }
  0xc8   :  { %219 = vsyncpa [#allocation8], 1 }
  0xc9   :  { %220 = vsyncpa [#allocation6], 1 }

</bundles_post_ra>
